<compile_context>
chip_gen: v7x
topology: tpu7x:2x2x1
jax: 0.10.0
libtpu: 0.0.40
codegen_flags: <defaults>
</compile_context>

<pallas_src>
import math

import jax
import jax.numpy as jnp
from jax.experimental import pallas as pl
from jax.experimental.pallas import tpu as pltpu

_LANE = 128  # vreg lane width / MXU-friendly feature width


def _round_up(v, m):
    return ((v + m - 1) // m) * m


def _mlp_encoder_kernel(x_ref, y_ref, w1x_ref, w1y_ref, b1_ref,
                        w2_ref, b2_ref, w3_ref, b3_ref, out_ref):
    """Fused 3-layer MLP on one row-block: (BM, xd)+(BM, yd) -> (BM, O_pad).

    Matmuls run in bf16 on the MXU with f32 accumulation; bias-add + ReLU stay
    in f32 (safe on v5e, fine on v6e/v7x).
    """
    xb = x_ref[...].astype(jnp.bfloat16)
    yb = y_ref[...].astype(jnp.bfloat16)

    # Split first layer (== dot(cat(x, y), W1) + b1, no concat needed).
    h = (jnp.dot(xb, w1x_ref[...], preferred_element_type=jnp.float32)
         + jnp.dot(yb, w1y_ref[...], preferred_element_type=jnp.float32)
         + b1_ref[...])
    h = jnp.maximum(h, 0.0)

    h = jnp.dot(h.astype(jnp.bfloat16), w2_ref[...],
                preferred_element_type=jnp.float32) + b2_ref[...]
    h = jnp.maximum(h, 0.0)

    r = jnp.dot(h.astype(jnp.bfloat16), w3_ref[...],
                preferred_element_type=jnp.float32) + b3_ref[...]
    out_ref[...] = r.astype(out_ref.dtype)


def mlp_encoder_forward(x, y, tpu_params, rs_dim, *, block_m=1024):
    """x: (B, N, x_dim), y: (B, N, y_dim) -> r: (B, N, *rs_dim)."""
    B, N, xd = x.shape
    yd = y.shape[-1]
    M = B * N

    # Glue: flatten rows (no concat — W1 is split into W1x/W1y instead).
    x2 = x.reshape(M, xd)
    y2 = y.reshape(M, yd)

    Hp = tpu_params["w2"].shape[0]    # padded hidden width (multiple of 128)
    Op = tpu_params["w3"].shape[1]    # padded output width (multiple of 128)
    out_size = int(math.prod(rs_dim))

    # Row-block: full M if it fits, else block_m.  block_m is a multiple of 8,
    # and a full-extent block is always legal, so the (8,128) rule is
    # satisfied; a partial trailing block (M % block_m != 0) is masked by
    # Pallas automatically.
    bm = M if M <= block_m else block_m
    grid = (pl.cdiv(M, bm),)

    row_spec = lambda last: pl.BlockSpec((bm, last), lambda i: (i, 0))
    const_spec = lambda r, c: pl.BlockSpec((r, c), lambda i: (0, 0))

    flops = 2 * M * (xd * Hp + yd * Hp + Hp * Hp + Hp * Op)
    bytes_accessed = (
        M * (xd + yd) * x.dtype.itemsize            # activations in
        + M * Op * x.dtype.itemsize                 # activations out
        + ((xd + yd) * Hp + Hp * Hp + Hp * Op) * 2  # bf16 weights
        + (2 * Hp + Op) * 4                         # f32 biases
    )

    out = pl.pallas_call(
        _mlp_encoder_kernel,
        out_shape=jax.ShapeDtypeStruct((M, Op), x.dtype),
        grid=grid,
        in_specs=[
            row_spec(xd),                 # x rows   (pipelined)
            row_spec(yd),                 # y rows   (pipelined)
            const_spec(xd, Hp),           # W1x      (VMEM-resident)
            const_spec(yd, Hp),           # W1y
            const_spec(1, Hp),            # b1
            const_spec(Hp, Hp),           # W2
            const_spec(1, Hp),            # b2
            const_spec(Hp, Op),           # W3
            const_spec(1, Op),            # b3
        ],
        out_specs=pl.BlockSpec((bm, Op), lambda i: (i, 0)),
        compiler_params=pltpu.CompilerParams(
            dimension_semantics=("parallel",)),
        cost_estimate=pl.CostEstimate(
            flops=flops, transcendentals=0, bytes_accessed=bytes_accessed),
    )(x2, y2,
      tpu_params["w1x"], tpu_params["w1y"], tpu_params["b1"],
      tpu_params["w2"], tpu_params["b2"],
      tpu_params["w3"], tpu_params["b3"])

    # Glue: drop lane padding, then ReshapeLast(output_shape).
    return out[:, :out_size].reshape(B, N, *rs_dim)


def init_mlp_encoder_params(key, x_dim, y_dim, rs_dim, h_dim, dtype=jnp.float32):
    """Deterministic init mimicking torch.nn.Linear defaults:
    weight, bias ~ U(-1/sqrt(fan_in), 1/sqrt(fan_in)). Returns logical params."""
    rs_dim = rs_dim if isinstance(rs_dim, tuple) else (rs_dim, 1)
    out_size = int(math.prod(rs_dim))
    in_dim = x_dim + y_dim

    def linear(k, fan_in, fan_out):
        kw, kb = jax.random.split(k)
        bound = 1.0 / math.sqrt(fan_in)
        w = jax.random.uniform(kw, (fan_in, fan_out), dtype, -bound, bound)
        b = jax.random.uniform(kb, (1, fan_out), dtype, -bound, bound)
        return w, b

    k1, k2, k3 = jax.random.split(key, 3)
    w1, b1 = linear(k1, in_dim, h_dim)
    w2, b2 = linear(k2, h_dim, h_dim)
    w3, b3 = linear(k3, h_dim, out_size)
    params = dict(w1=w1, b1=b1, w2=w2, b2=b2, w3=w3, b3=b3)
    return params, rs_dim


def pad_params_for_tpu(params, x_dim, compute_dtype=jnp.bfloat16):
    """One-time TPU prep: split W1 into W1x/W1y, zero-pad hidden/output widths
    to a multiple of 128 lanes (exact for matmul+ReLU), weights -> bf16,
    biases stay f32."""
    w1, b1 = params["w1"], params["b1"]
    w2, b2 = params["w2"], params["b2"]
    w3, b3 = params["w3"], params["b3"]
    H = w1.shape[1]
    O = w3.shape[1]
    Hp = _round_up(H, _LANE)
    Op = _round_up(O, _LANE)

    def pad2(a, rows, cols):
        return jnp.pad(a, ((0, rows - a.shape[0]), (0, cols - a.shape[1])))

    w1x = w1[:x_dim]
    w1y = w1[x_dim:]
    return dict(
        w1x=pad2(w1x, w1x.shape[0], Hp).astype(compute_dtype),
        w1y=pad2(w1y, w1y.shape[0], Hp).astype(compute_dtype),
        b1=pad2(b1, 1, Hp).astype(jnp.float32),
        w2=pad2(w2, Hp, Hp).astype(compute_dtype),
        b2=pad2(b2, 1, Hp).astype(jnp.float32),
        w3=pad2(w3, Hp, Op).astype(compute_dtype),
        b3=pad2(b3, 1, Op).astype(jnp.float32),
    )


def _reference_forward_f32(x, y, params, rs_dim):
    """Pure-JAX f32 reference (module semantics)."""
    inp = jnp.concatenate([x, y], axis=2)
    h = jnp.maximum(inp @ params["w1"] + params["b1"], 0.0)
    h = jnp.maximum(h @ params["w2"] + params["b2"], 0.0)
    r = h @ params["w3"] + params["b3"]
    return r.reshape(*r.shape[:-1], *rs_dim)


def _reference_forward_bf16(x, y, params, rs_dim):
    """Pure-JAX reference matching the kernel's precision (bf16 matmuls,
    f32 accumulation, f32 bias/ReLU)."""
    bf = jnp.bfloat16
    inp = jnp.concatenate([x, y], axis=2).astype(bf)
    h = jnp.maximum(
        jnp.dot(inp, params["w1"].astype(bf),
                preferred_element_type=jnp.float32) + params["b1"], 0.0)
    h = jnp.maximum(
        jnp.dot(h.astype(bf), params["w2"].astype(bf),
                preferred_element_type=jnp.float32) + params["b2"], 0.0)
    r = (jnp.dot(h.astype(bf), params["w3"].astype(bf),
                 preferred_element_type=jnp.float32) + params["b3"])
    return r.astype(x.dtype).reshape(*r.shape[:-1], *rs_dim)


if __name__ == "__main__":
    # Small shapes consistent with the module's forward.
    B, N = 2, 8          # batch, num context points
    x_dim, y_dim = 4, 3  # x / y feature dims
    h_dim = 32           # hidden width
    rs_dim_arg = 16      # -> rs_dim = (16, 1), output (B, N, 16, 1)

    key = jax.random.PRNGKey(0)
    kx, ky, kp = jax.random.split(key, 3)

    x = jax.random.normal(kx, (B, N, x_dim), jnp.float32)
    y = jax.random.normal(ky, (B, N, y_dim), jnp.float32)

    params, rs_dim = init_mlp_encoder_params(kp, x_dim, y_dim, rs_dim_arg, h_dim)
    tpu_params = pad_params_for_tpu(params, x_dim)   # once, at init time

    r = mlp_encoder_forward(x, y, tpu_params, rs_dim)
    r = jax.block_until_ready(r)

    assert r.shape == (B, N, *rs_dim), r.shape

    # Precision-matched reference (bf16 matmuls / f32 accumulation): tight check.
    r_bf16 = _reference_forward_bf16(x, y, params, rs_dim)
    assert jnp.allclose(r, r_bf16, atol=1e-3, rtol=1e-3), "mismatch vs bf16 reference"

    # Full-f32 reference: loose check bounding total bf16 error.
    r_f32 = _reference_forward_f32(x, y, params, rs_dim)
    assert jnp.allclose(r, r_f32, atol=5e-2, rtol=5e-2), "mismatch vs f32 reference"

    print("KERNEL_OK")
</pallas_src>

<mosaic_0001>
module attributes {stable_mosaic.version = 11 : i64} {
  func.func @_mlp_encoder_kernel(%arg0: i32, %arg1: memref<16x4xf32, #tpu.memory_space<vmem>>, %arg2: memref<16x3xf32, #tpu.memory_space<vmem>>, %arg3: memref<4x128xbf16, #tpu.memory_space<vmem>>, %arg4: memref<3x128xbf16, #tpu.memory_space<vmem>>, %arg5: memref<1x128xf32, #tpu.memory_space<vmem>>, %arg6: memref<128x128xbf16, #tpu.memory_space<vmem>>, %arg7: memref<1x128xf32, #tpu.memory_space<vmem>>, %arg8: memref<128x128xbf16, #tpu.memory_space<vmem>>, %arg9: memref<1x128xf32, #tpu.memory_space<vmem>>, %arg10: memref<16x128xf32, #tpu.memory_space<vmem>>) attributes {dimension_semantics = [#tpu.dimension_semantics<parallel>], iteration_bounds = array<i64: 1>, scalar_prefetch = 0 : i64, scratch_operands = 0 : i64, tpu.core_type = #tpu.core_type<tc>, window_params = [{transform_indices = @transform_0, window_bounds = array<i64: 16, 4>}, {transform_indices = @transform_1, window_bounds = array<i64: 16, 3>}, {pipeline_mode = #tpu.pipeline_mode<synchronous>, transform_indices = @transform_2, window_bounds = array<i64: 4, 128>}, {pipeline_mode = #tpu.pipeline_mode<synchronous>, transform_indices = @transform_3, window_bounds = array<i64: 3, 128>}, {pipeline_mode = #tpu.pipeline_mode<synchronous>, transform_indices = @transform_4, window_bounds = array<i64: 1, 128>}, {pipeline_mode = #tpu.pipeline_mode<synchronous>, transform_indices = @transform_5, window_bounds = array<i64: 128, 128>}, {pipeline_mode = #tpu.pipeline_mode<synchronous>, transform_indices = @transform_6, window_bounds = array<i64: 1, 128>}, {pipeline_mode = #tpu.pipeline_mode<synchronous>, transform_indices = @transform_7, window_bounds = array<i64: 128, 128>}, {pipeline_mode = #tpu.pipeline_mode<synchronous>, transform_indices = @transform_8, window_bounds = array<i64: 1, 128>}, {transform_indices = @transform_9, window_bounds = array<i64: 16, 128>}]} {
    %c0 = arith.constant 0 : index
    %c0_0 = arith.constant 0 : index
    %0 = vector.load %arg1[%c0, %c0_0] : memref<16x4xf32, #tpu.memory_space<vmem>>, vector<16x4xf32>
    %1 = arith.truncf %0 : vector<16x4xf32> to vector<16x4xbf16>
    %c0_1 = arith.constant 0 : index
    %c0_2 = arith.constant 0 : index
    %2 = vector.load %arg2[%c0_1, %c0_2] : memref<16x3xf32, #tpu.memory_space<vmem>>, vector<16x3xf32>
    %3 = arith.truncf %2 : vector<16x3xf32> to vector<16x3xbf16>
    %c0_3 = arith.constant 0 : index
    %c0_4 = arith.constant 0 : index
    %4 = vector.load %arg3[%c0_3, %c0_4] : memref<4x128xbf16, #tpu.memory_space<vmem>>, vector<4x128xbf16>
    %cst = arith.constant dense<0.000000e+00> : vector<16x128xf32>
    %5 = tpu.matmul %1, %4, %cst {dimension_numbers = #tpu.dot_dimension_numbers<[1], [0], [0], [1], [0, 0, 1, 1], [], []>} : vector<16x4xbf16>, vector<4x128xbf16>, vector<16x128xf32> -> vector<16x128xf32>
    %c0_5 = arith.constant 0 : index
    %c0_6 = arith.constant 0 : index
    %6 = vector.load %arg4[%c0_5, %c0_6] : memref<3x128xbf16, #tpu.memory_space<vmem>>, vector<3x128xbf16>
    %cst_7 = arith.constant dense<0.000000e+00> : vector<16x128xf32>
    %7 = tpu.matmul %3, %6, %cst_7 {dimension_numbers = #tpu.dot_dimension_numbers<[1], [0], [0], [1], [0, 0, 1, 1], [], []>} : vector<16x3xbf16>, vector<3x128xbf16>, vector<16x128xf32> -> vector<16x128xf32>
    %8 = arith.addf %5, %7 : vector<16x128xf32>
    %c0_8 = arith.constant 0 : index
    %c0_9 = arith.constant 0 : index
    %9 = vector.load %arg5[%c0_8, %c0_9] : memref<1x128xf32, #tpu.memory_space<vmem>>, vector<1x128xf32>
    %10 = vector.broadcast %9 : vector<1x128xf32> to vector<16x128xf32>
    %11 = arith.addf %8, %10 : vector<16x128xf32>
    %cst_10 = arith.constant 0.000000e+00 : f32
    %12 = vector.broadcast %cst_10 : f32 to vector<16x128xf32>
    %13 = arith.maximumf %11, %12 : vector<16x128xf32>
    %14 = arith.truncf %13 : vector<16x128xf32> to vector<16x128xbf16>
    %c0_11 = arith.constant 0 : index
    %c0_12 = arith.constant 0 : index
    %15 = vector.load %arg6[%c0_11, %c0_12] : memref<128x128xbf16, #tpu.memory_space<vmem>>, vector<128x128xbf16>
    %cst_13 = arith.constant dense<0.000000e+00> : vector<16x128xf32>
    %16 = tpu.matmul %14, %15, %cst_13 {dimension_numbers = #tpu.dot_dimension_numbers<[1], [0], [0], [1], [0, 0, 1, 1], [], []>} : vector<16x128xbf16>, vector<128x128xbf16>, vector<16x128xf32> -> vector<16x128xf32>
    %c0_14 = arith.constant 0 : index
    %c0_15 = arith.constant 0 : index
    %17 = vector.load %arg7[%c0_14, %c0_15] : memref<1x128xf32, #tpu.memory_space<vmem>>, vector<1x128xf32>
    %18 = vector.broadcast %17 : vector<1x128xf32> to vector<16x128xf32>
    %19 = arith.addf %16, %18 : vector<16x128xf32>
    %cst_16 = arith.constant 0.000000e+00 : f32
    %20 = vector.broadcast %cst_16 : f32 to vector<16x128xf32>
    %21 = arith.maximumf %19, %20 : vector<16x128xf32>
    %22 = arith.truncf %21 : vector<16x128xf32> to vector<16x128xbf16>
    %c0_17 = arith.constant 0 : index
    %c0_18 = arith.constant 0 : index
    %23 = vector.load %arg8[%c0_17, %c0_18] : memref<128x128xbf16, #tpu.memory_space<vmem>>, vector<128x128xbf16>
    %cst_19 = arith.constant dense<0.000000e+00> : vector<16x128xf32>
    %24 = tpu.matmul %22, %23, %cst_19 {dimension_numbers = #tpu.dot_dimension_numbers<[1], [0], [0], [1], [0, 0, 1, 1], [], []>} : vector<16x128xbf16>, vector<128x128xbf16>, vector<16x128xf32> -> vector<16x128xf32>
    %c0_20 = arith.constant 0 : index
    %c0_21 = arith.constant 0 : index
    %25 = vector.load %arg9[%c0_20, %c0_21] : memref<1x128xf32, #tpu.memory_space<vmem>>, vector<1x128xf32>
    %26 = vector.broadcast %25 : vector<1x128xf32> to vector<16x128xf32>
    %27 = arith.addf %24, %26 : vector<16x128xf32>
    %c0_22 = arith.constant 0 : index
    %c0_23 = arith.constant 0 : index
    %28 = vector.load %arg10[%c0_22, %c0_23] : memref<16x128xf32, #tpu.memory_space<vmem>>, vector<16x128xf32>
    tpu.vector_store %arg10[%c0_22, %c0_23], %27 {strides = array<i32>} : memref<16x128xf32, #tpu.memory_space<vmem>>, vector<16x128xf32>,
    return
  }
  func.func @transform_0(%arg0: i32) -> (i32, i32) {
    %c0_i32 = arith.constant 0 : i32
    %c0_i32_0 = arith.constant 0 : i32
    return %arg0, %c0_i32 : i32, i32
  }
  func.func @transform_1(%arg0: i32) -> (i32, i32) {
    %c0_i32 = arith.constant 0 : i32
    %c0_i32_0 = arith.constant 0 : i32
    return %arg0, %c0_i32 : i32, i32
  }
  func.func @transform_2(%arg0: i32) -> (i32, i32) {
    %c0_i32 = arith.constant 0 : i32
    %c0_i32_0 = arith.constant 0 : i32
    %c0_i32_1 = arith.constant 0 : i32
    return %c0_i32, %c0_i32_0 : i32, i32
  }
  func.func @transform_3(%arg0: i32) -> (i32, i32) {
    %c0_i32 = arith.constant 0 : i32
    %c0_i32_0 = arith.constant 0 : i32
    %c0_i32_1 = arith.constant 0 : i32
    return %c0_i32, %c0_i32_0 : i32, i32
  }
  func.func @transform_4(%arg0: i32) -> (i32, i32) {
    %c0_i32 = arith.constant 0 : i32
    %c0_i32_0 = arith.constant 0 : i32
    %c0_i32_1 = arith.constant 0 : i32
    return %c0_i32, %c0_i32_0 : i32, i32
  }
  func.func @transform_5(%arg0: i32) -> (i32, i32) {
    %c0_i32 = arith.constant 0 : i32
    %c0_i32_0 = arith.constant 0 : i32
    %c0_i32_1 = arith.constant 0 : i32
    return %c0_i32, %c0_i32_0 : i32, i32
  }
  func.func @transform_6(%arg0: i32) -> (i32, i32) {
    %c0_i32 = arith.constant 0 : i32
    %c0_i32_0 = arith.constant 0 : i32
    %c0_i32_1 = arith.constant 0 : i32
    return %c0_i32, %c0_i32_0 : i32, i32
  }
  func.func @transform_7(%arg0: i32) -> (i32, i32) {
    %c0_i32 = arith.constant 0 : i32
    %c0_i32_0 = arith.constant 0 : i32
    %c0_i32_1 = arith.constant 0 : i32
    return %c0_i32, %c0_i32_0 : i32, i32
  }
  func.func @transform_8(%arg0: i32) -> (i32, i32) {
    %c0_i32 = arith.constant 0 : i32
    %c0_i32_0 = arith.constant 0 : i32
    %c0_i32_1 = arith.constant 0 : i32
    return %c0_i32, %c0_i32_0 : i32, i32
  }
  func.func @transform_9(%arg0: i32) -> (i32, i32) {
    %c0_i32 = arith.constant 0 : i32
    %c0_i32_0 = arith.constant 0 : i32
    return %arg0, %c0_i32 : i32, i32
  }
}

</mosaic_0001>

<bundles_post_ra>
// kernel: tpu_custom_call.1
= control target key start
LH: loop header
LB: loop body
LE: loop exit
PB: predicated region body
PF: predicated region fallthrough
CT: control target
= control target key end

     0   :  { %14 = vsyncpa [#allocation3], 0  ;;  %s882_s0 = inlined_call_operand.vmem [shape: f32[16,4], index: 0, kind: input, shape index: {}]   ;;  %s883_s1 = inlined_call_operand.vmem [shape: f32[16,3], index: 1, kind: input, shape index: {}]   ;;  %s884_s2 = inlined_call_operand.vmem [shape: bf16[4,128], index: 2, kind: input, shape index: {}]   ;;  %s885_s3 = inlined_call_operand.hbm [shape: bf16[3,128], index: 3, kind: input, shape index: {}]   ;;  %s886_s4 = inlined_call_operand.hbm [shape: f32[1,128], index: 4, kind: input, shape index: {}]   ;;  %s887_s5 = inlined_call_operand.hbm [shape: bf16[128,128], index: 5, kind: input, shape index: {}]   ;;  %s888_s6 = inlined_call_operand.hbm [shape: f32[1,128], index: 6, kind: input, shape index: {}]   ;;  %s889_s7 = inlined_call_operand.vmem [shape: bf16[128,128], index: 7, kind: input, shape index: {}]   ;;  %s890_s8 = inlined_call_operand.vmem [shape: f32[1,128], index: 8, kind: input, shape index: {}]   ;;  %s891_s9 = inlined_call_operand.hbm [shape: f32[16,128], index: 9, kind: output, shape index: {}]  }
   0x1   :  { %15 = vsyncpa [#allocation6], 0 }
   0x2   :  { %16 = vsyncpa [#allocation9], 0 }
   0x3   :  { %17 = vsyncpa [#allocation4], 0  ;;  %s692_s30 = smov [#allocation5]   ;;  %s693_s11 = smov [#allocation2]  }
   0x4   :  { %s40_s10 = sshll.u32 %s692_s30, 4  ;;  %s30_s12 = sshll.u32 %s693_s11, 4  ;;  %s41_s10 = int_to_ptr.vmem [resolvable:$true] %s40_s10  ;;  %s31_s12 = int_to_ptr.vmem [resolvable:$true] %s30_s12 }
   0x5   :  { %s574_s15 = scalar_lea.hbm %s886_s4, 16 }
   0x6   :  { %p575_p0 = scmp.ne.s32.totalorder %s886_s4, %s574_s15  ;;  %p578_p1 = scmp.lt.u32.totalorder %s574_s15, %s886_s4 }
   0x8   :  { %p580_p2 = pnand %p578_p1, %p575_p0 }
   0xa   :  { %583 = shalt.err (!%p580_p2)
}
   0xb   :  { %s584_s20 = scalar_lea.vmem %s41_s10, 16  ;;  %s588_s21 = scalar_lea.vmem %s41_s10, 32 }
   0xc   :  { %p585_p3 = scmp.ne.s32.totalorder %s41_s10, %s584_s20  ;;  %p589_p4 = scmp.lt.s32.totalorder %s41_s10, %s41_s10 }
   0xd   :  { %p590_p5 = scmp.lt.s32.totalorder %s588_s21, %s584_s20 }
   0xf   :  { %p591_p6 = por %p590_p5, %p589_p4 }
  0x11   :  { %p592_p7 = pnand %p591_p6, %p585_p3 }
  0x13   :  { %595 = shalt.err (!%p592_p7)
}
  0x14   :  { %43 = dma.hbm_to_vmem [thread:$0]  %s886_s4, 16, %s41_s10, [#allocation6]  }
  0x15   :  { %s596_s26 = scalar_lea.hbm %s885_s3, 32 }
  0x16   :  { %p597_p8 = scmp.ne.s32.totalorder %s885_s3, %s596_s26  ;;  %p600_p9 = scmp.lt.u32.totalorder %s596_s26, %s885_s3 }
  0x18   :  { %p602_p10 = pnand %p600_p9, %p597_p8 }
  0x1a   :  { %605 = shalt.err (!%p602_p10)
}
  0x1b   :  { %s606_s11 = scalar_lea.vmem %s31_s12, 32  ;;  %p611_p12 = scmp.lt.s32.totalorder %s31_s12, %s31_s12 }
  0x1c   :  { %p607_p11 = scmp.ne.s32.totalorder %s31_s12, %s606_s11  ;;  %p612_p13 = scmp.lt.s32.totalorder %s606_s11, %s606_s11 }
  0x1e   :  { %p613_p0 = por %p612_p13, %p611_p12 }
  0x20   :  { %p614_p1 = pnand %p613_p0, %p607_p11 }
  0x22   :  { %617 = shalt.err (!%p614_p1)
}
  0x23   :  { %33 = dma.hbm_to_vmem [thread:$0]  %s885_s3, 32, %s31_s12, [#allocation3]  }
  0x24   :  { %s694_s13 = smov [#allocation7]   ;;  %s618_s17 = scalar_lea.hbm %s887_s5, 1024 }
  0x25   :  { %s49_s14 = sshll.u32 %s694_s13, 4  ;;  %p619_p2 = scmp.ne.s32.totalorder %s887_s5, %s618_s17  ;;  %s50_s14 = int_to_ptr.vmem [resolvable:$true] %s49_s14 }
  0x26   :  { %p622_p3 = scmp.lt.u32.totalorder %s618_s17, %s887_s5 }
  0x28   :  { %p624_p4 = pnand %p622_p3, %p619_p2 }
  0x2a   :  { %627 = shalt.err (!%p624_p4)
}
  0x2b   :  { %s628_s22 = scalar_lea.vmem %s50_s14, 1024  ;;  %p633_p6 = scmp.lt.s32.totalorder %s50_s14, %s50_s14 }
  0x2c   :  { %p629_p5 = scmp.ne.s32.totalorder %s50_s14, %s628_s22  ;;  %p634_p7 = scmp.lt.s32.totalorder %s628_s22, %s628_s22 }
  0x2e   :  { %p635_p8 = por %p634_p7, %p633_p6 }
  0x30   :  { %p636_p9 = pnand %p635_p8, %p629_p5 }
  0x32   :  { %639 = shalt.err (!%p636_p9)
}
  0x33   :  { %s695_s3 = smov 64   ;;  %s696_s12 = smov 4  }
  0x34   :  { %55 = dma.hbm_to_vmem [thread:$0]  %s887_s5, 1024, %s50_s14, [#allocation6], %s695_s3, %s695_s3, %s696_s12  }
  0x35   :  { %s697_s25 = smov [#allocation8]   ;;  %s640_s29 = scalar_lea.hbm %s888_s6, 16 }
  0x36   :  { %s62_s26 = sshll.u32 %s697_s25, 4  ;;  %p641_p10 = scmp.ne.s32.totalorder %s888_s6, %s640_s29  ;;  %s63_s26 = int_to_ptr.vmem [resolvable:$true] %s62_s26 }
  0x37   :  { %p644_p11 = scmp.lt.u32.totalorder %s640_s29, %s888_s6 }
  0x39   :  { %p646_p12 = pnand %p644_p11, %p641_p10 }
  0x3b   :  { %649 = shalt.err (!%p646_p12)
}
  0x3c   :  { %s650_s13 = scalar_lea.vmem %s63_s26, 16  ;;  %s654_s5 = scalar_lea.vmem %s63_s26, 32 }
  0x3d   :  { %p651_p13 = scmp.ne.s32.totalorder %s63_s26, %s650_s13  ;;  %p655_p0 = scmp.lt.s32.totalorder %s63_s26, %s63_s26 }
  0x3e   :  { %p656_p1 = scmp.lt.s32.totalorder %s654_s5, %s650_s13 }
  0x40   :  { %p657_p2 = por %p656_p1, %p655_p0 }
  0x42   :  { %p658_p3 = pnand %p657_p2, %p651_p13 }
  0x44   :  { %661 = shalt.err (!%p658_p3)
}
  0x45   :  { %65 = dma.hbm_to_vmem [thread:$0]  %s888_s6, 16, %s63_s26, [#allocation9]  }
  0x46   :  { %684 = dma.done.wait [#allocation3], 32  }
  0x47   :  { %685 = vsyncadd [#allocation3], 4294967264 }
  0x48   :  { %686 = dma.done.wait [#allocation6], 1040  }
  0x49   :  { %687 = vsyncadd [#allocation6], 4294966256 }
  0x4a   :  { %688 = dma.done.wait [#allocation9], 16  }
  0x4b   :  { %689 = vsyncadd [#allocation9], 4294967280  ;;  %vm95_vm0 = vcmask 1040384   ;;  %v698_v0 = vmov 0.0   ;;  %vm96_vm1 = vcmask 1041408   ;;  %v699_v1 = vmov 65535  }
  0x4c   :  { %500 = vmatprep.subr.bf16.mxu1 %v698_v0  ;;  %494 = vmatprep.subr.bf16.mxu0 %v698_v0  ;;  %v97_v2 = vsel %vm95_vm0, 4294967295, %v699_v1  ;;  %vm700_vm2 = vmmov 0   ;;  %v89_v4 = vld [vmem:[%s884_s2] sm:$0x3]  ;;  %v84_v9 = vld [vmem:[%s882_s0 + $0x8] sm:$0xff]  ;;  %vm143_vm3 = vcmask 31744  }
  0x4d   :  { %502 = vmatprep.mubr.msk.bf16.mxu1 %vm700_vm2, %v698_v0  ;;  %496 = vmatprep.mubr.msk.bf16.mxu0 %vm700_vm2, %v698_v0  ;;  %v98_v3 = vsel %vm96_vm1, %v97_v2, 0  ;;  %v90_v5 = vld [vmem:[#allocation2] sm:$0x3]  ;;  %v148_v7 = vsel %vm96_vm1, %v89_v4, 0  ;;  %v87_v11 = vld [vmem:[%s883_s1 + $0x8] sm:$0xff]  ;;  %vm91_vm4 = vcmask 23552  }
  0x4e   :  { %v83_v6 = vld [vmem:[%s882_s0] sm:$0xff]  ;;  %v100_v8 = vand.u32 %v98_v3, %v90_v5  ;;  %501 = vmatpush3.bf16.msra.mxu1 %v148_v7  ;;  %v559_v15 = vld [vmem:[#allocation7 + $0x8] sm:$0xff]   ;;  %v560_v16 = vld [vmem:[#allocation7 + $0x10] sm:$0xff]   ;;  %s701_s6 = smov [#allocation10]  }
  0x4f   :  { %v86_v10 = vld [vmem:[%s883_s1] sm:$0xff]  ;;  %v85_v12 = vpack.c.bf16 %v84_v9, %v83_v6  ;;  %526 = vmatprep.subr.bf16.mxu1 %v698_v0  ;;  %v563_v19 = vld [vmem:[#allocation7 + $0x28] sm:$0xff]   ;;  %v564_v20 = vld [vmem:[#allocation7 + $0x30] sm:$0xff]   ;;  %s437_s16 = sshll.u32 %s701_s6, 4  ;;  %s438_s16 = int_to_ptr.vmem [resolvable:$true] %s437_s16 }
  0x50   :  { %v88_v13 = vpack.c.bf16 %v87_v11, %v86_v10  ;;  %495 = vmatpush3.bf16.msra.mxu0 %v100_v8  ;;  %v558_v14 = vld [vmem:[#allocation7] sm:$0xff]   ;;  %v561_v17 = vld [vmem:[#allocation7 + $0x18] sm:$0xff]   ;;  %v568_v24 = vld [vmem:[%s889_s7 + $0x10] sm:$0xff]   ;;  %p667_p5 = scmp.lt.s32.totalorder %s438_s16, %s438_s16 }
  0x51   :  { %506 = vmatprep.subr.bf16.mxu0 %v698_v0  ;;  %503 = vmatmul.mubr.msk.bf16.vlgmr.msra.gmra.mrb[0].mxu1 %vm143_vm3, %v85_v12  ;;  %v562_v18 = vld [vmem:[#allocation7 + $0x20] sm:$0xff]   ;;  %v565_v21 = vld [vmem:[#allocation7 + $0x38] sm:$0xff]   ;;  %v572_v44 = vld [vmem:[%s889_s7 + $0x30] sm:$0xff]  }
  0x52   :  { %542 = vmatprep.mubr.msk.bf16.mxu1 %vm700_vm2, %v698_v0  ;;  %v566_v22 = vld [vmem:[%s889_s7] sm:$0xff]   ;;  %v567_v23 = vld [vmem:[%s889_s7 + $0x8] sm:$0xff]   ;;  %v569_v25 = vld [vmem:[%s889_s7 + $0x18] sm:$0xff]  }
  0x53   :  { %497 = vmatmul.mubr.msk.bf16.vlgmr.msra.gmra.mrb[0].mxu0 %vm91_vm4, %v88_v13  ;;  %527 = vmatpush3.bf16.msra.mxu1 %v566_v22  ;;  %v570_v26 = vld [vmem:[%s889_s7 + $0x20] sm:$0xff]   ;;  %v571_v27 = vld [vmem:[%s889_s7 + $0x28] sm:$0xff]   ;;  %v573_v45 = vld [vmem:[%s889_s7 + $0x38] sm:$0xff]   ;;  %s662_s7 = scalar_lea.vmem %s438_s16, 256 }
  0x54   :  { %507 = vmatpush3.bf16.msra.mxu0 %v558_v14  ;;  %522 = vmatprep.mubr.msk.bf16.mxu0 %vm700_vm2, %v698_v0  ;;  %v453_v30 = vld [vmem:[#allocation5] ss:$0 sm:$0xff]  ;;  %v454_v46 = vld [vmem:[#allocation8] ss:$0 sm:$0xff]  ;;  %v463_v56 = vld [vmem:[%s890_s8] ss:$0 sm:$0xff]  ;;  %p663_p4 = scmp.ne.s32.totalorder %s438_s16, %s662_s7  ;;  %p668_p6 = scmp.lt.s32.totalorder %s662_s7, %s662_s7 }
  0x55   :  { %508 = vmatprep.subr.bf16.mxu0 %v698_v0  ;;  %528 = vmatprep.subr.bf16.mxu1 %v698_v0 }
  0x56   :  { %p669_p7 = por %p668_p6, %p667_p5 }
  0x57   :  { %529 = vmatpush3.bf16.msra.mxu1 %v567_v23 }
  0x58   :  { %509 = vmatpush3.bf16.msra.mxu0 %v559_v15  ;;  %530 = vmatprep.subr.bf16.mxu1 %v698_v0  ;;  %p670_p8 = pnand %p669_p7, %p663_p4 }
  0x59   :  { %510 = vmatprep.subr.bf16.mxu0 %v698_v0 }
  0x5b   :  { %531 = vmatpush3.bf16.msra.mxu1 %v568_v24 }
  0x5c   :  { %511 = vmatpush3.bf16.msra.mxu0 %v560_v16  ;;  %532 = vmatprep.subr.bf16.mxu1 %v698_v0 }
  0x5d   :  { %512 = vmatprep.subr.bf16.mxu0 %v698_v0 }
  0x5f   :  { %533 = vmatpush3.bf16.msra.mxu1 %v569_v25 }
  0x60   :  { %513 = vmatpush3.bf16.msra.mxu0 %v561_v17  ;;  %534 = vmatprep.subr.bf16.mxu1 %v698_v0 }
  0x61   :  { %514 = vmatprep.subr.bf16.mxu0 %v698_v0 }
  0x63   :  { %535 = vmatpush3.bf16.msra.mxu1 %v570_v26 }
  0x64   :  { %515 = vmatpush3.bf16.msra.mxu0 %v562_v18  ;;  %536 = vmatprep.subr.bf16.mxu1 %v698_v0 }
  0x65   :  { %516 = vmatprep.subr.bf16.mxu0 %v698_v0 }
  0x67   :  { %537 = vmatpush3.bf16.msra.mxu1 %v571_v27 }
  0x68   :  { %517 = vmatpush3.bf16.msra.mxu0 %v563_v19  ;;  %538 = vmatprep.subr.bf16.mxu1 %v698_v0 }
  0x69   :  { %518 = vmatprep.subr.bf16.mxu0 %v698_v0 }
  0x6b   :  { %539 = vmatpush3.bf16.msra.mxu1 %v572_v44 }
  0x6c   :  { %519 = vmatpush3.bf16.msra.mxu0 %v564_v20  ;;  %540 = vmatprep.subr.bf16.mxu1 %v698_v0 }
  0x6d   :  { %520 = vmatprep.subr.bf16.mxu0 %v698_v0 }
  0x6f   :  { %541 = vmatpush3.bf16.msra.mxu1 %v573_v45 }
  0x70   :  { %521 = vmatpush3.bf16.msra.mxu0 %v565_v21 }
 0x124   :  { %v184_v28 = vpop.f32.mrb[0].mxu1 }
 0x125   :  { %v504_v31 = vpop.f32.mrb[1].mxu1 }
 0x126   :  { %v136_v29 = vpop.f32.mrb[0].mxu0  ;;  %v187_v34 = vpop.f32.mrb[2].mxu1 }
 0x127   :  { %v185_v32 = vadd.f32 %v184_v28, %v136_v29  ;;  %v498_v33 = vpop.f32.mrb[1].mxu0  ;;  %v505_v36 = vpop.f32.mrb[3].mxu1 }
 0x128   :  { %v139_v35 = vpop.f32.mrb[2].mxu0 }
 0x129   :  { %v198_v37 = vadd.f32 %v453_v30, %v185_v32  ;;  %v188_v38 = vadd.f32 %v187_v34, %v139_v35  ;;  %v499_v39 = vpop.f32.mrb[3].mxu0 }
 0x12b   :  { %v199_v40 = vadd.f32 %v453_v30, %v188_v38  ;;  %v200_v41 = vmax.f32 %v198_v37, 0.0 }
 0x12d   :  { %v201_v42 = vmax.f32 %v199_v40, 0.0 }
 0x12f   :  { %v202_v43 = vpack.c.bf16 %v201_v42, %v200_v41 }
 0x131   :  { %523 = vmatmul.mubr.bf16.vlgmr.msra.gmra.mrb[4].mxu0 %v202_v43 }
 0x204   :  { %v308_v47 = vpop.f32.mrb[4].mxu0 }
 0x205   :  { %v309_v48 = vadd.f32 %v454_v46, %v308_v47  ;;  %v524_v49 = vpop.f32.mrb[5].mxu0 }
 0x206   :  { %v311_v50 = vpop.f32.mrb[6].mxu0 }
 0x207   :  { %v312_v51 = vadd.f32 %v454_v46, %v311_v50  ;;  %v525_v52 = vpop.f32.mrb[7].mxu0  ;;  %v315_v53 = vmax.f32 %v309_v48, 0.0 }
 0x209   :  { %v316_v54 = vmax.f32 %v312_v51, 0.0 }
 0x20b   :  { %v317_v55 = vpack.c.bf16 %v316_v54, %v315_v53 }
 0x20d   :  { %543 = vmatmul.mubr.bf16.vlgmr.msra.gmra.mrb[4].mxu1 %v317_v55 }
 0x2e0   :  { %v423_v57 = vpop.f32.mrb[4].mxu1 }
 0x2e1   :  { %v424_v58 = vadd.f32 %v463_v56, %v423_v57  ;;  %v544_v59 = vpop.f32.mrb[5].mxu1 }
 0x2e2   :  { %v426_v60 = vpop.f32.mrb[6].mxu1 }
 0x2e3   :  { %430 = vst [vmem:[#allocation10] sm:$0xff] %v424_v58  ;;  %v427_v61 = vadd.f32 %v463_v56, %v426_v60  ;;  %v545_v62 = vpop.f32.mrb[7].mxu1 }
 0x2e5   :  { %431 = vst [vmem:[#allocation10 + $0x8] sm:$0xff] %v427_v61 }
 0x2e6   :  { %673 = shalt.err (!%p670_p8)
}
 0x2e7   :  { %s674_s18 = scalar_lea.hbm %s891_s9, 256 }
 0x2e8   :  { %p675_p9 = scmp.ne.s32.totalorder %s891_s9, %s674_s18  ;;  %p678_p10 = scmp.lt.u32.totalorder %s674_s18, %s891_s9 }
 0x2ea   :  { %p680_p11 = pnand %p678_p10, %p675_p9 }
 0x2ec   :  { %683 = shalt.err (!%p680_p11)
}
 0x2ed   :  { %s702_s3 = smov 128   ;;  %s703_s12 = smov 8  }
 0x2ee   :  { %443 = dma.vmem_to_hbm [thread:$0]  %s438_s16, 256, %s891_s9, [#allocation4], %s702_s3, %s702_s3, %s703_s12  }
 0x2ef   :  { %690 = dma.done.wait [#allocation4], 256  }
 0x2f0   :  { %691 = vsyncadd [#allocation4], 4294967040 }
 0x2f1   :  { %447 = vsyncpa [#allocation3], 1 }
 0x2f2   :  { %448 = vsyncpa [#allocation6], 1 }
 0x2f3   :  { %449 = vsyncpa [#allocation9], 1 }
 0x2f4   :  { %450 = vsyncpa [#allocation4], 1 }

</bundles_post_ra>
